<compile_context>
chip_gen: v5e
topology: v5e:2x2
jax: 0.10.0
libtpu: 0.0.40
codegen_flags: <defaults>
</compile_context>

<pallas_src>
import functools

import jax
import jax.numpy as jnp
from jax.experimental import pallas as pl
from jax.experimental.pallas import tpu as pltpu


def _round_up(x, m):
    return ((x + m - 1) // m) * m


def _prior_kernel(s_ref, a_ref, w1s_ref, w1a_ref, b1_ref, wh_ref, bh_ref,
                  y_ref, *, s_dim):
    """One batch tile: fused fc1+relu and fused (fc21|fc22) head + epilogue."""
    mxu_dt = w1s_ref.dtype
    prec = (jax.lax.Precision.HIGHEST if mxu_dt == jnp.float32
            else jax.lax.Precision.DEFAULT)

    # fc1: h = relu(s_prev @ W1_s + a @ W1_a + b1)  (in-kernel "concat" via row
    # split of W1; avoids any HBM-side concat of the inputs).
    # TODO(synk): on v5e a single K=(s_dim+a_dim) matmul (minor-dim concat of
    # the two tiles into a VMEM scratch) would halve fc1 MXU pushes; kept as
    # two dots here to avoid minor-dim-concat lowering risk.
    h = jnp.dot(s_ref[...].astype(mxu_dt), w1s_ref[...],
                preferred_element_type=jnp.float32, precision=prec)
    h = h + jnp.dot(a_ref[...].astype(mxu_dt), w1a_ref[...],
                    preferred_element_type=jnp.float32, precision=prec)
    h = jnp.maximum(h + b1_ref[...], 0.0)            # f32 epilogue

    # fused heads: z[:, :s_dim] -> loc pre-act, z[:, s_dim:2*s_dim] -> scale pre-act
    z = jnp.dot(h.astype(mxu_dt), wh_ref[...],
                preferred_element_type=jnp.float32, precision=prec)
    z = z + bh_ref[...]

    # Numerically stable softplus(z) + 0.1 on the "scale" lanes only.
    # (exp/log1p still run on all 128 padded lanes; selection via a (1, n_pad)
    # iota broadcast inside the where, not a full [TB, n_pad] iota slab.)
    sp = jnp.maximum(z, 0.0) + jnp.log1p(jnp.exp(-jnp.abs(z))) + 0.1
    lane = jax.lax.broadcasted_iota(jnp.int32, (1, z.shape[1]), 1)
    y = jnp.where(lane >= s_dim, sp, z)               # lane-dense single store
    y_ref[...] = y.astype(y_ref.dtype)


def prior_forward(s_prev, a, params, *, mxu_dtype=jnp.bfloat16,
                  out_dtype=jnp.float32, max_batch_tile=2048,
                  return_fused=False):
    """loc, scale = Prior(s_prev, a).

    mxu_dtype : operand dtype for the MXU matmuls (bf16 recommended on
                v5e/v6e/v7x; float32 + HIGHEST precision for parity tests).
                Accumulation and the bias/relu/softplus epilogue are f32.
    out_dtype : dtype of the kernel's HBM output slab (bf16 halves writeback).
    return_fused : if True, return the raw [B, n_pad] slab (lanes [0, s_dim) =
                loc, [s_dim, 2*s_dim) = scale) so downstream kernels can avoid
                two extra column-slice copies.
    """
    B, s_dim = s_prev.shape
    a_dim = a.shape[1]
    DIM = params["w1"].shape[1]

    # --- weight prep (hoisted by jit/scan if called per-timestep) ---
    # fused head weights, zero-padded to a 128-lane-dense output slab
    n_out = 2 * s_dim
    n_pad = max(128, _round_up(n_out, 128))
    wh = jnp.concatenate([params["w21"], params["w22"]], axis=1)      # [DIM, 2*s_dim]
    bh = jnp.concatenate([params["b21"], params["b22"]], axis=1)      # [1, 2*s_dim]
    wh = jnp.pad(wh, ((0, 0), (0, n_pad - n_out))).astype(mxu_dtype)  # [DIM, n_pad]
    bh = jnp.pad(bh, ((0, 0), (0, n_pad - n_out)))                    # [1, n_pad] f32
    # row-split of W1 so the concat happens inside the kernel
    w1s = params["w1"][:s_dim, :].astype(mxu_dtype)                   # [s_dim, DIM]
    w1a = params["w1"][s_dim:, :].astype(mxu_dtype)                   # [a_dim, DIM]
    b1 = params["b1"]                                                 # [1, DIM] f32

    # --- batch tiling: no wrapper-side padding; ragged last block handled by
    # Pallas (OOB rows dropped on store). Tile chosen so that (a) per-step
    # overhead is amortized, (b) >=2 grid steps exist for v7x's two TCs when B
    # allows, (c) the [TB, DIM] f32 intermediate fits the 32 MiB VMEM budget.
    TB = min(max_batch_tile, max(8, _round_up(pl.cdiv(B, 2), 8)))
    grid = (pl.cdiv(B, TB),)

    const = lambda i: (0, 0)   # weights/biases resident across the whole grid
    kernel = functools.partial(_prior_kernel, s_dim=s_dim)

    mxu_bytes = jnp.dtype(mxu_dtype).itemsize
    out_bytes = jnp.dtype(out_dtype).itemsize
    cost = pl.CostEstimate(
        flops=2 * B * ((s_dim + a_dim) * DIM + DIM * n_pad),
        transcendentals=2 * B * n_pad,                         # exp + log1p
        bytes_accessed=(B * (s_dim + a_dim) * 4                # inputs (f32)
                        + B * n_pad * out_bytes                # output slab
                        + ((s_dim + a_dim) * DIM + DIM * n_pad) * mxu_bytes
                        + (DIM + n_pad) * 4),                  # biases
    )

    y = pl.pallas_call(
        kernel,
        out_shape=jax.ShapeDtypeStruct((B, n_pad), out_dtype),
        grid=grid,
        in_specs=[
            pl.BlockSpec((TB, s_dim), lambda i: (i, 0)),   # s_prev tile
            pl.BlockSpec((TB, a_dim), lambda i: (i, 0)),   # a tile
            pl.BlockSpec((s_dim, DIM), const),             # W1_s (resident)
            pl.BlockSpec((a_dim, DIM), const),             # W1_a (resident)
            pl.BlockSpec((1, DIM), const),                 # b1   (resident)
            pl.BlockSpec((DIM, n_pad), const),             # fused head W (resident)
            pl.BlockSpec((1, n_pad), const),               # fused head b (resident)
        ],
        out_specs=pl.BlockSpec((TB, n_pad), lambda i: (i, 0)),
        compiler_params=pltpu.CompilerParams(
            dimension_semantics=("parallel",),             # 2 TCs on v7x
            # ~18 MiB live at TB=2048/DIM=1024 (incl. double-buffered tiles);
            # 32 MiB keeps headroom on v7x (64 MiB physical) and v5e/v6e.
            vmem_limit_bytes=32 * 1024 * 1024,
        ),
        cost_estimate=cost,
    )(s_prev, a, w1s, w1a, b1, wh, bh)

    if return_fused:
        return y, n_out
    loc = y[:, :s_dim]
    scale = y[:, s_dim:n_out]
    return loc, scale


def init_params(key, s_dim, a_dim, DIM):
    """Deterministic synthetic parameters. Weights stored as (in, out)."""
    ks = jax.random.split(key, 6)
    in_dim = s_dim + a_dim

    def lin(kw, kb, fan_in, fan_out):
        # mimic PyTorch Linear default init (uniform +/- 1/sqrt(fan_in))
        bound = 1.0 / jnp.sqrt(fan_in)
        w = jax.random.uniform(kw, (fan_in, fan_out), jnp.float32, -bound, bound)
        b = jax.random.uniform(kb, (1, fan_out), jnp.float32, -bound, bound)
        return w, b

    w1, b1 = lin(ks[0], ks[1], in_dim, DIM)
    w21, b21 = lin(ks[2], ks[3], DIM, s_dim)
    w22, b22 = lin(ks[4], ks[5], DIM, s_dim)
    return {"w1": w1, "b1": b1, "w21": w21, "b21": b21, "w22": w22, "b22": b22}


if __name__ == "__main__":
    B, s_dim, a_dim, DIM = 8, 16, 16, 128

    key = jax.random.PRNGKey(0)
    kp, ks, ka = jax.random.split(key, 3)

    params = init_params(kp, s_dim, a_dim, DIM)
    s_prev = jax.random.normal(ks, (B, s_dim), jnp.float32)
    a = jax.random.normal(ka, (B, a_dim), jnp.float32)

    # reference in plain JAX (module semantics, f32, highest matmul precision)
    hp = jax.lax.Precision.HIGHEST
    x = jnp.concatenate([s_prev, a], axis=1)
    h = jnp.maximum(jnp.dot(x, params["w1"], precision=hp) + params["b1"], 0.0)
    loc_ref = jnp.dot(h, params["w21"], precision=hp) + params["b21"]
    scale_ref = jax.nn.softplus(jnp.dot(h, params["w22"], precision=hp)
                                + params["b22"]) + 0.1

    # f32 MXU path, HIGHEST precision (parity with the reference)
    loc32, scale32 = prior_forward(s_prev, a, params, mxu_dtype=jnp.float32)
    jax.block_until_ready((loc32, scale32))
    assert loc32.shape == (B, s_dim) and scale32.shape == (B, s_dim)
    assert jnp.allclose(loc32, loc_ref, atol=2e-4, rtol=2e-4), "loc mismatch (f32)"
    assert jnp.allclose(scale32, scale_ref, atol=2e-4, rtol=2e-4), "scale mismatch (f32)"

    # bf16 MXU operands + bf16 output slab (recommended throughput path)
    loc16, scale16 = prior_forward(s_prev, a, params,
                                   mxu_dtype=jnp.bfloat16,
                                   out_dtype=jnp.bfloat16)
    jax.block_until_ready((loc16, scale16))
    assert jnp.allclose(loc16.astype(jnp.float32), loc_ref,
                        atol=7e-2, rtol=7e-2), "loc mismatch (bf16)"
    assert jnp.allclose(scale16.astype(jnp.float32), scale_ref,
                        atol=7e-2, rtol=7e-2), "scale mismatch (bf16)"

    # TODO(synk): for RNN-style per-timestep use, jit+scan the caller (weight
    # prep hoists out of the loop) or extend the grid with an "arbitrary" time
    # axis reusing the same constant weight index_maps to amortize launches.

    print("KERNEL_OK")
</pallas_src>

<mosaic_0001>
module attributes {stable_mosaic.version = 11 : i64} {
  func.func @_prior_kernel(%arg0: i32, %arg1: memref<8x16xf32, #tpu.memory_space<vmem>>, %arg2: memref<8x16xf32, #tpu.memory_space<vmem>>, %arg3: memref<16x128xf32, #tpu.memory_space<vmem>>, %arg4: memref<16x128xf32, #tpu.memory_space<vmem>>, %arg5: memref<1x128xf32, #tpu.memory_space<vmem>>, %arg6: memref<128x128xf32, #tpu.memory_space<vmem>>, %arg7: memref<1x128xf32, #tpu.memory_space<vmem>>, %arg8: memref<8x128xf32, #tpu.memory_space<vmem>>) attributes {dimension_semantics = [#tpu.dimension_semantics<parallel>], iteration_bounds = array<i64: 1>, scalar_prefetch = 0 : i64, scratch_operands = 0 : i64, tpu.core_type = #tpu.core_type<tc>, window_params = [{transform_indices = @transform_0, window_bounds = array<i64: 8, 16>}, {transform_indices = @transform_1, window_bounds = array<i64: 8, 16>}, {pipeline_mode = #tpu.pipeline_mode<synchronous>, transform_indices = @transform_2, window_bounds = array<i64: 16, 128>}, {pipeline_mode = #tpu.pipeline_mode<synchronous>, transform_indices = @transform_3, window_bounds = array<i64: 16, 128>}, {pipeline_mode = #tpu.pipeline_mode<synchronous>, transform_indices = @transform_4, window_bounds = array<i64: 1, 128>}, {pipeline_mode = #tpu.pipeline_mode<synchronous>, transform_indices = @transform_5, window_bounds = array<i64: 128, 128>}, {pipeline_mode = #tpu.pipeline_mode<synchronous>, transform_indices = @transform_6, window_bounds = array<i64: 1, 128>}, {transform_indices = @transform_7, window_bounds = array<i64: 8, 128>}]} {
    %c0 = arith.constant 0 : index
    %c0_0 = arith.constant 0 : index
    %0 = vector.load %arg1[%c0, %c0_0] : memref<8x16xf32, #tpu.memory_space<vmem>>, vector<8x16xf32>
    %c0_1 = arith.constant 0 : index
    %c0_2 = arith.constant 0 : index
    %1 = vector.load %arg3[%c0_1, %c0_2] : memref<16x128xf32, #tpu.memory_space<vmem>>, vector<16x128xf32>
    %cst = arith.constant dense<0.000000e+00> : vector<8x128xf32>
    %2 = tpu.matmul %0, %1, %cst {dimension_numbers = #tpu.dot_dimension_numbers<[1], [0], [0], [1], [0, 0, 1, 1], [], []>, precision = #tpu.contract_precision<fp32>} : vector<8x16xf32>, vector<16x128xf32>, vector<8x128xf32> -> vector<8x128xf32>
    %c0_3 = arith.constant 0 : index
    %c0_4 = arith.constant 0 : index
    %3 = vector.load %arg2[%c0_3, %c0_4] : memref<8x16xf32, #tpu.memory_space<vmem>>, vector<8x16xf32>
    %c0_5 = arith.constant 0 : index
    %c0_6 = arith.constant 0 : index
    %4 = vector.load %arg4[%c0_5, %c0_6] : memref<16x128xf32, #tpu.memory_space<vmem>>, vector<16x128xf32>
    %cst_7 = arith.constant dense<0.000000e+00> : vector<8x128xf32>
    %5 = tpu.matmul %3, %4, %cst_7 {dimension_numbers = #tpu.dot_dimension_numbers<[1], [0], [0], [1], [0, 0, 1, 1], [], []>, precision = #tpu.contract_precision<fp32>} : vector<8x16xf32>, vector<16x128xf32>, vector<8x128xf32> -> vector<8x128xf32>
    %6 = arith.addf %2, %5 : vector<8x128xf32>
    %c0_8 = arith.constant 0 : index
    %c0_9 = arith.constant 0 : index
    %7 = vector.load %arg5[%c0_8, %c0_9] : memref<1x128xf32, #tpu.memory_space<vmem>>, vector<1x128xf32>
    %8 = vector.broadcast %7 : vector<1x128xf32> to vector<8x128xf32>
    %9 = arith.addf %6, %8 : vector<8x128xf32>
    %cst_10 = arith.constant 0.000000e+00 : f32
    %10 = vector.broadcast %cst_10 : f32 to vector<8x128xf32>
    %11 = arith.maximumf %9, %10 : vector<8x128xf32>
    %c0_11 = arith.constant 0 : index
    %c0_12 = arith.constant 0 : index
    %12 = vector.load %arg6[%c0_11, %c0_12] : memref<128x128xf32, #tpu.memory_space<vmem>>, vector<128x128xf32>
    %cst_13 = arith.constant dense<0.000000e+00> : vector<8x128xf32>
    %13 = tpu.matmul %11, %12, %cst_13 {dimension_numbers = #tpu.dot_dimension_numbers<[1], [0], [0], [1], [0, 0, 1, 1], [], []>, precision = #tpu.contract_precision<fp32>} : vector<8x128xf32>, vector<128x128xf32>, vector<8x128xf32> -> vector<8x128xf32>
    %c0_14 = arith.constant 0 : index
    %c0_15 = arith.constant 0 : index
    %14 = vector.load %arg7[%c0_14, %c0_15] : memref<1x128xf32, #tpu.memory_space<vmem>>, vector<1x128xf32>
    %15 = vector.broadcast %14 : vector<1x128xf32> to vector<8x128xf32>
    %16 = arith.addf %13, %15 : vector<8x128xf32>
    %cst_16 = arith.constant 0.000000e+00 : f32
    %17 = vector.broadcast %cst_16 : f32 to vector<8x128xf32>
    %18 = arith.maximumf %16, %17 : vector<8x128xf32>
    %19 = math.absf %16 : vector<8x128xf32>
    %cst_17 = arith.constant 0.000000e+00 : f32
    %20 = vector.broadcast %cst_17 : f32 to vector<8x128xf32>
    %21 = arith.subf %20, %19 : vector<8x128xf32>
    %22 = math.exp %21 : vector<8x128xf32>
    %23 = math.log1p %22 : vector<8x128xf32>
    %24 = arith.addf %18, %23 : vector<8x128xf32>
    %cst_18 = arith.constant 1.000000e-01 : f32
    %25 = vector.broadcast %cst_18 : f32 to vector<8x128xf32>
    %26 = arith.addf %24, %25 : vector<8x128xf32>
    %27 = tpu.iota {dimensions = array<i32: 1>} : vector<1x128xi32>
    %c16_i32 = arith.constant 16 : i32
    %28 = vector.broadcast %c16_i32 : i32 to vector<1x128xi32>
    %29 = arith.cmpi sge, %27, %28 : vector<1x128xi32>
    %30 = vector.shape_cast %29 : vector<1x128xi1> to vector<1x128xi1>
    %31 = vector.broadcast %30 : vector<1x128xi1> to vector<8x128xi1>
    %32 = arith.select %31, %26, %16 : vector<8x128xi1>, vector<8x128xf32>
    %c0_19 = arith.constant 0 : index
    %c0_20 = arith.constant 0 : index
    %33 = vector.load %arg8[%c0_19, %c0_20] : memref<8x128xf32, #tpu.memory_space<vmem>>, vector<8x128xf32>
    tpu.vector_store %arg8[%c0_19, %c0_20], %32 {strides = array<i32>} : memref<8x128xf32, #tpu.memory_space<vmem>>, vector<8x128xf32>,
    return
  }
  func.func @transform_0(%arg0: i32) -> (i32, i32) {
    %c0_i32 = arith.constant 0 : i32
    %c0_i32_0 = arith.constant 0 : i32
    return %arg0, %c0_i32 : i32, i32
  }
  func.func @transform_1(%arg0: i32) -> (i32, i32) {
    %c0_i32 = arith.constant 0 : i32
    %c0_i32_0 = arith.constant 0 : i32
    return %arg0, %c0_i32 : i32, i32
  }
  func.func @transform_2(%arg0: i32) -> (i32, i32) {
    %c0_i32 = arith.constant 0 : i32
    %c0_i32_0 = arith.constant 0 : i32
    %c0_i32_1 = arith.constant 0 : i32
    return %c0_i32, %c0_i32_0 : i32, i32
  }
  func.func @transform_3(%arg0: i32) -> (i32, i32) {
    %c0_i32 = arith.constant 0 : i32
    %c0_i32_0 = arith.constant 0 : i32
    %c0_i32_1 = arith.constant 0 : i32
    return %c0_i32, %c0_i32_0 : i32, i32
  }
  func.func @transform_4(%arg0: i32) -> (i32, i32) {
    %c0_i32 = arith.constant 0 : i32
    %c0_i32_0 = arith.constant 0 : i32
    %c0_i32_1 = arith.constant 0 : i32
    return %c0_i32, %c0_i32_0 : i32, i32
  }
  func.func @transform_5(%arg0: i32) -> (i32, i32) {
    %c0_i32 = arith.constant 0 : i32
    %c0_i32_0 = arith.constant 0 : i32
    %c0_i32_1 = arith.constant 0 : i32
    return %c0_i32, %c0_i32_0 : i32, i32
  }
  func.func @transform_6(%arg0: i32) -> (i32, i32) {
    %c0_i32 = arith.constant 0 : i32
    %c0_i32_0 = arith.constant 0 : i32
    %c0_i32_1 = arith.constant 0 : i32
    return %c0_i32, %c0_i32_0 : i32, i32
  }
  func.func @transform_7(%arg0: i32) -> (i32, i32) {
    %c0_i32 = arith.constant 0 : i32
    %c0_i32_0 = arith.constant 0 : i32
    return %arg0, %c0_i32 : i32, i32
  }
}

</mosaic_0001>

<bundles_post_ra>
// kernel: tpu_custom_call.1
= control target key start
LH: loop header
LB: loop body
LE: loop exit
PB: predicated region body
PF: predicated region fallthrough
CT: control target
= control target key end

     0   :  { %12 = vsyncpa [#allocation3], 0  ;;  %s1356_s0 = inlined_call_operand.hbm [shape: f32[8,16], index: 0, kind: input, shape index: {}]   ;;  %s1357_s1 = inlined_call_operand.hbm [shape: f32[8,16], index: 1, kind: input, shape index: {}]   ;;  %s1358_s2 = inlined_call_operand.hbm [shape: f32[16,128], index: 2, kind: input, shape index: {}]   ;;  %s1359_s3 = inlined_call_operand.hbm [shape: f32[16,128], index: 3, kind: input, shape index: {}]   ;;  %s1360_s4 = inlined_call_operand.vmem [shape: f32[1,128], index: 4, kind: input, shape index: {}]   ;;  %s1361_s5 = inlined_call_operand.hbm [shape: f32[128,128], index: 5, kind: input, shape index: {}]   ;;  %s1362_s6 = inlined_call_operand.vmem [shape: f32[1,128], index: 6, kind: input, shape index: {}]   ;;  %s1363_s7 = inlined_call_operand.hbm [shape: f32[8,128], index: 7, kind: output, shape index: {}]  }
   0x1   :  { %13 = vsyncpa [#allocation6], 0 }
   0x2   :  { %14 = vsyncpa [#allocation9], 0  ;;  %s32_s26 = sshll.u32 %s1357_s1, 4  ;;  %s33_s26 = int_to_ptr.hbm [resolvable:$true] %s32_s26 }
   0x3   :  { %15 = vsyncpa [#allocation4], 0  ;;  %s1007_s27 = smov [#allocation5]   ;;  %s55_s8 = sshll.u32 %s1359_s3, 4  ;;  %s56_s8 = int_to_ptr.hbm [resolvable:$true] %s55_s8 }
   0x4   :  { %s34_s28 = sshll.u32 %s1007_s27, 4  ;;  %s1008_s9 = smov [#allocation8]   ;;  %s35_s28 = int_to_ptr.vmem [resolvable:$true] %s34_s28 }
   0x5   :  { %37 = dma.hbm_to_vmem [thread:$0]  %s33_s26, 128, %s35_s28, [#allocation6]  }
   0x6   :  { %s57_s10 = sshll.u32 %s1008_s9, 4  ;;  %s21_s13 = sshll.u32 %s1356_s0, 4  ;;  %s58_s10 = int_to_ptr.vmem [resolvable:$true] %s57_s10  ;;  %s22_s13 = int_to_ptr.hbm [resolvable:$true] %s21_s13 }
   0x7   :  { %s1009_s1 = smov 128   ;;  %s1010_s14 = smov 8  }
   0x8   :  { %63 = dma.hbm_to_vmem [thread:$0]  %s56_s8, 256, %s58_s10, [#allocation9], %s1009_s1, %s1009_s1, %s1010_s14  }
   0x9   :  { %s42_s17 = sshll.u32 %s1358_s2, 4  ;;  %s1011_s18 = smov [#allocation2]   ;;  %s43_s17 = int_to_ptr.hbm [resolvable:$true] %s42_s17 }
   0xa   :  { %s23_s19 = sshll.u32 %s1011_s18, 4  ;;  %s1012_s3 = smov [#allocation7]   ;;  %s24_s19 = int_to_ptr.vmem [resolvable:$true] %s23_s19 }
   0xb   :  { %26 = dma.hbm_to_vmem [thread:$0]  %s22_s13, 128, %s24_s19, [#allocation3]  }
   0xc   :  { %s44_s20 = sshll.u32 %s1012_s3, 4  ;;  %s70_s0 = sshll.u32 %s1361_s5, 4  ;;  %s45_s20 = int_to_ptr.vmem [resolvable:$true] %s44_s20  ;;  %s71_s0 = int_to_ptr.hbm [resolvable:$true] %s70_s0 }
   0xd   :  { %50 = dma.hbm_to_vmem [thread:$0]  %s43_s17, 256, %s45_s20, [#allocation6], %s1009_s1, %s1009_s1, %s1010_s14  }
   0xe   :  { %s1013_s23 = smov [#allocation10]  }
   0xf   :  { %s72_s24 = sshll.u32 %s1013_s23, 4  ;;  %s73_s24 = int_to_ptr.vmem [resolvable:$true] %s72_s24 }
  0x10   :  { %78 = dma.hbm_to_vmem [thread:$0]  %s71_s0, 2048, %s73_s24, [#allocation9], %s1009_s1, %s1009_s1, %s1010_s14  }
  0x11   :  { %999 = dma.done.wait [#allocation3], 128  }
  0x12   :  { %1000 = vsyncadd [#allocation3], 4294967168 }
  0x13   :  { %1001 = dma.done.wait [#allocation6], 384  }
  0x14   :  { %1002 = vsyncadd [#allocation6], 4294966912 }
  0x15   :  { %1003 = dma.done.wait [#allocation9], 2304  }
  0x16   :  { %1004 = vsyncadd [#allocation9], 4294964992  ;;  %vm107_vm0 = vcmask 130048   ;;  %v106_v0 = vld [vmem:[#allocation8 + $0x8] sm:$0xff]  ;;  %v105_v1 = vld [vmem:[#allocation8] sm:$0xff]  ;;  %s829_s29 = sshll.u32 %s1363_s7, 4  ;;  %s830_s29 = int_to_ptr.hbm [resolvable:$true] %s829_s29 }
  0x17   :  { %v101_v2 = vld [vmem:[#allocation2] sm:$0xff]  ;;  %v1070_v3 = vand.u32 4294901760, %v106_v0  ;;  %v1072_v4 = vand.u32 4294901760, %v105_v1  ;;  %v104_v5 = vld [vmem:[#allocation5] sm:$0xff]  ;;  %v103_v7 = vld [vmem:[#allocation7 + $0x8] sm:$0xff] }
  0x18   :  { %v271_v6 = vsel %vm107_vm0, %v101_v2, 0  ;;  %v102_v8 = vld [vmem:[#allocation7] sm:$0xff]  ;;  %v109_v9 = vsel %vm107_vm0, %v104_v5, 0  ;;  %v1076_v11 = vand.u32 4294901760, %v103_v7  ;;  %v453_v33 = vld [vmem:[#allocation10 + $0x78] sm:$0xff]  ;;  %v452_v34 = vld [vmem:[#allocation10 + $0x70] sm:$0xff] }
  0x19   :  { %v1074_v10 = vand.u32 4294901760, %v271_v6  ;;  %v1078_v12 = vand.u32 4294901760, %v102_v8  ;;  %126 = vmatpush.msra.mxu2 %v1070_v3  ;;  %v153_v13 = vsub.f32 %v106_v0, %v1070_v3  ;;  %v1082_v14 = vand.u32 4294901760, %v109_v9  ;;  %v451_v35 = vld [vmem:[#allocation10 + $0x68] sm:$0xff]  ;;  %v450_v39 = vld [vmem:[#allocation10 + $0x60] sm:$0xff]  ;;  %v449_v40 = vld [vmem:[#allocation10 + $0x58] sm:$0xff] }
  0x1a   :  { %v159_v15 = vsub.f32 %v105_v1, %v1072_v4  ;;  %v1089_v17 = vsub.f32 %v103_v7, %v1076_v11  ;;  %372 = vmatpush.msra.mxu1 %v1076_v11  ;;  %v1115_v36 = vand.u32 4294901760, %v453_v33  ;;  %v1117_v37 = vand.u32 4294901760, %v452_v34  ;;  %v448_v41 = vld [vmem:[#allocation10 + $0x50] sm:$0xff] }
  0x1b   :  { %v1086_v16 = vsub.f32 %v271_v6, %v1074_v10  ;;  %128 = vmatpush.msra.mxu2 %v1072_v4  ;;  %v154_v18 = vand.u32 4294901760, %v153_v13  ;;  %v1094_v19 = vsub.f32 %v109_v9, %v1082_v14  ;;  %v1097_v21 = vsub.f32 %v102_v8, %v1078_v12 }
  0x1c   :  { %v160_v20 = vand.u32 4294901760, %v159_v15  ;;  %347 = vmatpush.msra.mxu0 %v1089_v17  ;;  %374 = vmatpush.msra.mxu1 %v1078_v12  ;;  %v316_v29 = vand.u32 4294901760, %v1089_v17  ;;  %v1119_v38 = vand.u32 4294901760, %v451_v35  ;;  %v1124_v43 = vand.u32 4294901760, %v450_v39 }
  0x1d   :  { %185 = vmatpush.msrb.mxu2 %v153_v13  ;;  %v155_v22 = vsub.f32 %v153_v13, %v154_v18  ;;  %v131_v23 = vand.u32 4294901760, %v1094_v19  ;;  %v293_v25 = vand.u32 4294901760, %v1086_v16  ;;  %v322_v31 = vand.u32 4294901760, %v1097_v21  ;;  %v446_v13 = vld [vmem:[#allocation10 + $0x40] sm:$0xff] }
  0x1e   :  { %v161_v24 = vsub.f32 %v159_v15, %v160_v20  ;;  %350 = vmatpush.msra.mxu0 %v1097_v21  ;;  %v317_v32 = vsub.f32 %v1089_v17, %v316_v29  ;;  %v1126_v44 = vand.u32 4294901760, %v449_v40  ;;  %v1128_v45 = vand.u32 4294901760, %v448_v41 }
  0x1f   :  { %188 = vmatpush.msrb.mxu2 %v159_v15  ;;  %v156_v26 = vand.u32 4294901760, %v155_v22  ;;  %v132_v27 = vsub.f32 %v1094_v19, %v131_v23  ;;  %353 = vmatmul.f32.vlgmr.msra.gmra.mxu0 %v1086_v16  ;;  %v323_v42 = vsub.f32 %v1097_v21, %v322_v31  ;;  %v1132_v46 = vsub.f32 %v453_v33, %v1115_v36 }
  0x20   :  { %v162_v28 = vand.u32 4294901760, %v161_v24  ;;  %378 = vmatmul.f32.vlgmr.msra.gmra.mxu1 %v293_v25  ;;  %v1135_v47 = vsub.f32 %v452_v34, %v1117_v37  ;;  %v1138_v48 = vsub.f32 %v451_v35, %v1119_v38  ;;  %459 = vmatpush.msrb.mxu0 %v1115_v36  ;;  %v318_v49 = vand.u32 4294901760, %v317_v32  ;;  %v443_v24 = vld [vmem:[#allocation10 + $0x28] sm:$0xff] }
  0x21   :  { %157 = vmatpush.msra.mxu3 %v156_v26  ;;  %v133_v30 = vand.u32 4294901760, %v132_v27  ;;  %v1143_v50 = vsub.f32 %v450_v39, %v1124_v43  ;;  %v1146_v51 = vsub.f32 %v449_v40, %v1126_v44  ;;  %v501_v52 = vand.u32 4294901760, %v1132_v46  ;;  %v441_v39 = vld [vmem:[#allocation10 + $0x18] sm:$0xff] }
  0x22   :  { %v507_v53 = vand.u32 4294901760, %v1135_v47  ;;  %v513_v54 = vand.u32 4294901760, %v1138_v48  ;;  %461 = vmatpush.msrb.mxu0 %v1117_v37  ;;  %v1153_v55 = vsub.f32 %v448_v41, %v1128_v45  ;;  %v324_v56 = vand.u32 4294901760, %v323_v42 }
  0x23   :  { %134 = vmatmul.f32.vlgmr.msra.gmra.mxu2 %v133_v30  ;;  %163 = vmatpush.msra.mxu3 %v162_v28  ;;  %v519_v57 = vand.u32 4294901760, %v1143_v50  ;;  %v502_v58 = vsub.f32 %v1132_v46, %v501_v52  ;;  %v525_v61 = vand.u32 4294901760, %v1146_v51  ;;  %v294_v6 = vsub.f32 %v1086_v16, %v293_v25  ;;  %v442_v30 = vld [vmem:[#allocation10 + $0x20] sm:$0xff] }
  0x24   :  { %165 = vmatmul.f32.vlgmr.msra.gmra.mxu3 %v1082_v14  ;;  %237 = vmatpush.msra.mxu2 %v154_v18  ;;  %v508_v59 = vsub.f32 %v1135_v47, %v507_v53  ;;  %v514_v60 = vsub.f32 %v1138_v48, %v513_v54  ;;  %v531_v1 = vand.u32 4294901760, %v1153_v55  ;;  %v1215_v15 = vand.u32 4294901760, %v446_v13 }
  0x25   :  { %210 = vmatpush.msrb.mxu3 %v1070_v3  ;;  %463 = vmatpush.msrb.mxu0 %v1119_v38  ;;  %v503_v62 = vand.u32 4294901760, %v502_v58  ;;  %v520_v0 = vsub.f32 %v1143_v50, %v519_v57  ;;  %v295_v9 = vand.u32 4294901760, %v294_v6  ;;  %v1256_v34 = vand.u32 4294901760, %v442_v30  ;;  %v440_v58 = vld [vmem:[#allocation10 + $0x10] sm:$0xff] }
  0x26   :  { %241 = vmatpush.msra.mxu2 %v160_v20  ;;  %v509_v63 = vand.u32 4294901760, %v508_v59  ;;  %v515_v2 = vand.u32 4294901760, %v514_v60  ;;  %v532_v5 = vsub.f32 %v1153_v55, %v531_v1  ;;  %v1221_v17 = vsub.f32 %v446_v13, %v1215_v15 }
  0x27   :  { %212 = vmatpush.msrb.mxu3 %v1072_v4  ;;  %465 = vmatpush.msrb.mxu0 %v1124_v43  ;;  %v1268_v42 = vsub.f32 %v442_v30, %v1256_v34 }
  0x28   :  { %504 = vmatpush.msrb.mxu1 %v503_v62  ;;  %v533_v8 = vand.u32 4294901760, %v532_v5  ;;  %v543_v21 = vand.u32 4294901760, %v1221_v17 }
  0x29   :  { %262 = vmatpush.msra.mxu3 %v1070_v3  ;;  %v526_v3 = vsub.f32 %v1146_v51, %v525_v61  ;;  %467 = vmatpush.msrb.mxu0 %v1126_v44  ;;  %v567_v60 = vand.u32 4294901760, %v1268_v42 }
  0x2a   :  { %510 = vmatpush.msrb.mxu1 %v509_v63  ;;  %v544_v26 = vsub.f32 %v1221_v17, %v543_v21  ;;  %v1279_v63 = vand.u32 4294901760, %v440_v58 }
  0x2b   :  { %264 = vmatpush.msra.mxu3 %v1072_v4  ;;  %191 = vmatmul.f32.vlgmr.msrb.gmra.mxu2 %v1094_v19  ;;  %v521_v4 = vand.u32 4294901760, %v520_v0  ;;  %v527_v7 = vand.u32 4294901760, %v526_v3  ;;  %v444_v19 = vld [vmem:[#allocation10 + $0x30] sm:$0xff]  ;;  %v568_v3 = vsub.f32 %v1268_v42, %v567_v60 }
  0x2c   :  { %216 = vmatmul.f32.vlgmr.msrb.gmra.mxu3 %v131_v23  ;;  %288 = vmatpush.msrb.mxu2 %v1076_v11  ;;  %v1235_v23 = vand.u32 4294901760, %v444_v19  ;;  %v578_v5 = vsub.f32 %v440_v58, %v1279_v63 }
  0x2d   :  { %319 = vmatpush.msrb.mxu3 %v318_v49  ;;  %469 = vmatpush.msrb.mxu0 %v1128_v45  ;;  %v1270_v49 = vand.u32 4294901760, %v441_v39 }
  0x2e   :  { %290 = vmatpush.msrb.mxu2 %v1078_v12  ;;  %516 = vmatpush.msrb.mxu1 %v515_v2  ;;  %v1245_v28 = vsub.f32 %v444_v19, %v1235_v23  ;;  %v439_v2 = vld [vmem:[#allocation10 + $0x8] sm:$0xff]  ;;  %v579_v13 = vand.u32 4294901760, %v578_v5 }
  0x2f   :  { %325 = vmatpush.msrb.mxu3 %v324_v56  ;;  %v1277_v62 = vsub.f32 %v441_v39, %v1270_v49  ;;  %v1292_v6 = vand.u32 4294901760, %v439_v2 }
  0x30   :  { %522 = vmatpush.msrb.mxu1 %v521_v4  ;;  %v555_v33 = vand.u32 4294901760, %v1245_v28 }
  0x31   :  { %v573_v4 = vand.u32 4294901760, %v1277_v62 }
  0x32   :  { %528 = vmatpush.msrb.mxu1 %v527_v7  ;;  %v556_v41 = vsub.f32 %v1245_v28, %v555_v33 }
  0x33   :  { %243 = vmatmul.f32.vlgmr.msra.gmra.mxu2 %v1082_v14 }
  0x34   :  { %266 = vmatmul.f32.vlgmr.msra.gmra.mxu3 %v1082_v14  ;;  %399 = vmatpush.msra.mxu2 %v316_v29  ;;  %v1249_v29 = vand.u32 4294901760, %v443_v24  ;;  %v557_v59 = vand.u32 4294901760, %v556_v41 }
  0x35   :  { %424 = vmatpush.msra.mxu3 %v1076_v11  ;;  %534 = vmatpush.msrb.mxu1 %v533_v8  ;;  %v447_v11 = vld [vmem:[#allocation10 + $0x48] sm:$0xff]  ;;  %v438_v8 = vld [vmem:[#allocation10] sm:$0xff] }
  0x36   :  { %403 = vmatpush.msra.mxu2 %v322_v31  ;;  %v545_v31 = vand.u32 4294901760, %v544_v26  ;;  %v1260_v35 = vsub.f32 %v443_v24, %v1249_v29  ;;  %v1300_v19 = vand.u32 4294901760, %v438_v8  ;;  %v580_v24 = vsub.f32 %v578_v5, %v579_v13 }
  0x37   :  { %426 = vmatpush.msra.mxu3 %v1078_v12  ;;  %v1210_v12 = vand.u32 4294901760, %v447_v11 }
  0x38   :  { %v561_v56 = vand.u32 4294901760, %v1260_v35  ;;  %v590_v26 = vsub.f32 %v438_v8, %v1300_v19  ;;  %v581_v30 = vand.u32 4294901760, %v580_v24 }
  0x39   :  { %v1213_v14 = vsub.f32 %v447_v11, %v1210_v12  ;;  %471 = vmatpush.msrb.mxu0 %v1210_v12  ;;  %v574_v11 = vsub.f32 %v1277_v62, %v573_v4 }
  0x3a   :  { %v562_v0 = vsub.f32 %v1260_v35, %v561_v56 }
  0x3b   :  { %296 = vmatmul.f32.vlgmr.msrb.gmra.mxu2 %v295_v9  ;;  %v537_v16 = vand.u32 4294901760, %v1213_v14  ;;  %473 = vmatpush.msrb.mxu0 %v1215_v15  ;;  %v569_v9 = vand.u32 4294901760, %v568_v3 }
  0x3c   :  { %327 = vmatmul.f32.vlgmr.msrb.gmra.mxu3 %v1074_v10  ;;  %602 = vmatpush.msrb.mxu2 %v1132_v46  ;;  %v563_v7 = vand.u32 4294901760, %v562_v0 }
  0x3d   :  { %655 = vmatpush.msrb.mxu3 %v1115_v36  ;;  %v538_v20 = vsub.f32 %v1213_v14, %v537_v16 }
  0x3e   :  { %605 = vmatpush.msrb.mxu2 %v1135_v47 }
  0x3f   :  { %657 = vmatpush.msrb.mxu3 %v1117_v37  ;;  %v539_v25 = vand.u32 4294901760, %v538_v20  ;;  %v575_v20 = vand.u32 4294901760, %v574_v11 }
  0x40   :  { %608 = vmatpush.msrb.mxu2 %v1138_v48 }
  0x41   :  { %659 = vmatpush.msrb.mxu3 %v1119_v38  ;;  %540 = vmatpush.msrb.mxu1 %v539_v25 }
  0x42   :  { %611 = vmatpush.msrb.mxu2 %v1143_v50 }
  0x43   :  { %405 = vmatmul.f32.vlgmr.msra.gmra.mxu2 %v1074_v10  ;;  %661 = vmatpush.msrb.mxu3 %v1124_v43 }
  0x44   :  { %428 = vmatmul.f32.vlgmr.msra.gmra.mxu3 %v1074_v10  ;;  %614 = vmatpush.msrb.mxu2 %v1146_v51  ;;  %v445_v10 = vld [vmem:[#allocation10 + $0x38] sm:$0xff] }
  0x45   :  { %663 = vmatpush.msrb.mxu3 %v1126_v44  ;;  %v1223_v18 = vand.u32 4294901760, %v445_v10  ;;  %546 = vmatpush.msrb.mxu1 %v545_v31 }
  0x46   :  { %617 = vmatpush.msrb.mxu2 %v1153_v55 }
  0x47   :  { %665 = vmatpush.msrb.mxu3 %v1128_v45  ;;  %v1233_v22 = vsub.f32 %v445_v10, %v1223_v18  ;;  %475 = vmatpush.msrb.mxu0 %v1223_v18  ;;  %v584_v10 = vsub.f32 %v439_v2, %v1292_v6 }
  0x48   :  { %620 = vmatpush.msrb.mxu2 %v1213_v14 }
  0x49   :  { %667 = vmatpush.msrb.mxu3 %v1210_v12  ;;  %v549_v27 = vand.u32 4294901760, %v1233_v22  ;;  %477 = vmatpush.msrb.mxu0 %v1235_v23  ;;  %v585_v25 = vand.u32 4294901760, %v584_v10 }
  0x4a   :  { %623 = vmatpush.msrb.mxu2 %v1221_v17  ;;  %v849_v17 = vld [vmem:[%s1360_s4] ss:$0 sm:$0xff]  ;;  %s1014_s4 = smov [#allocation11]  }
  0x4b   :  { %669 = vmatpush.msrb.mxu3 %v1215_v15  ;;  %v550_v32 = vsub.f32 %v1233_v22, %v549_v27  ;;  %479 = vmatpush.msrb.mxu0 %v1249_v29  ;;  %v586_v31 = vsub.f32 %v584_v10, %v585_v25 }
  0x4c   :  { %626 = vmatpush.msrb.mxu2 %v1233_v22 }
  0x4d   :  { %671 = vmatpush.msrb.mxu3 %v1223_v18  ;;  %v551_v40 = vand.u32 4294901760, %v550_v32  ;;  %481 = vmatpush.msrb.mxu0 %v1256_v34  ;;  %v591_v32 = vand.u32 4294901760, %v590_v26  ;;  %v587_v39 = vand.u32 4294901760, %v586_v31 }
  0x4e   :  { %629 = vmatpush.msrb.mxu2 %v1245_v28 }
  0x4f   :  { %673 = vmatpush.msrb.mxu3 %v1235_v23  ;;  %552 = vmatpush.msrb.mxu1 %v551_v40  ;;  %v592_v40 = vsub.f32 %v590_v26, %v591_v32 }
  0x50   :  { %632 = vmatpush.msrb.mxu2 %v1260_v35  ;;  %483 = vmatpush.msrb.mxu0 %v1270_v49 }
  0x51   :  { %675 = vmatpush.msrb.mxu3 %v1249_v29  ;;  %558 = vmatpush.msrb.mxu1 %v557_v59  ;;  %v593_v41 = vand.u32 4294901760, %v592_v40 }
  0x52   :  { %635 = vmatpush.msrb.mxu2 %v1268_v42  ;;  %485 = vmatpush.msrb.mxu0 %v1279_v63 }
  0x53   :  { %677 = vmatpush.msrb.mxu3 %v1256_v34  ;;  %564 = vmatpush.msrb.mxu1 %v563_v7 }
  0x54   :  { %638 = vmatpush.msrb.mxu2 %v1277_v62  ;;  %487 = vmatpush.msrb.mxu0 %v1292_v6 }
  0x55   :  { %679 = vmatpush.msrb.mxu3 %v1270_v49  ;;  %570 = vmatpush.msrb.mxu1 %v569_v9 }
  0x56   :  { %641 = vmatpush.msrb.mxu2 %v578_v5  ;;  %489 = vmatpush.msrb.mxu0 %v1300_v19 }
  0x57   :  { %681 = vmatpush.msrb.mxu3 %v1279_v63  ;;  %576 = vmatpush.msrb.mxu1 %v575_v20 }
  0x58   :  { %696 = vmatpush.msra.mxu0 %v501_v52  ;;  %644 = vmatpush.msrb.mxu2 %v584_v10 }
  0x59   :  { %683 = vmatpush.msrb.mxu3 %v1292_v6  ;;  %582 = vmatpush.msrb.mxu1 %v581_v30 }
  0x5a   :  { %700 = vmatpush.msra.mxu0 %v507_v53  ;;  %647 = vmatpush.msrb.mxu2 %v590_v26 }
  0x5b   :  { %685 = vmatpush.msrb.mxu3 %v1300_v19  ;;  %588 = vmatpush.msrb.mxu1 %v587_v39 }
  0x5c   :  { %704 = vmatpush.msra.mxu0 %v513_v54 }
  0x5d   :  { %594 = vmatpush.msrb.mxu1 %v593_v41 }
  0x5e   :  { %708 = vmatpush.msra.mxu0 %v519_v57 }
  0x5f   :  { %763 = vmatpush.msra.mxu1 %v1115_v36 }
  0x60   :  { %712 = vmatpush.msra.mxu0 %v525_v61 }
  0x61   :  { %765 = vmatpush.msra.mxu1 %v1117_v37 }
  0x62   :  { %716 = vmatpush.msra.mxu0 %v531_v1 }
  0x63   :  { %767 = vmatpush.msra.mxu1 %v1119_v38 }
  0x64   :  { %720 = vmatpush.msra.mxu0 %v537_v16 }
  0x65   :  { %769 = vmatpush.msra.mxu1 %v1124_v43 }
  0x66   :  { %724 = vmatpush.msra.mxu0 %v543_v21 }
  0x67   :  { %771 = vmatpush.msra.mxu1 %v1126_v44 }
  0x68   :  { %728 = vmatpush.msra.mxu0 %v549_v27 }
  0x69   :  { %773 = vmatpush.msra.mxu1 %v1128_v45 }
  0x6a   :  { %732 = vmatpush.msra.mxu0 %v555_v33 }
  0x6b   :  { %775 = vmatpush.msra.mxu1 %v1210_v12 }
  0x6c   :  { %736 = vmatpush.msra.mxu0 %v561_v56 }
  0x6d   :  { %777 = vmatpush.msra.mxu1 %v1215_v15 }
  0x6e   :  { %740 = vmatpush.msra.mxu0 %v567_v60 }
  0x6f   :  { %779 = vmatpush.msra.mxu1 %v1223_v18 }
  0x70   :  { %744 = vmatpush.msra.mxu0 %v573_v4 }
  0x71   :  { %781 = vmatpush.msra.mxu1 %v1235_v23 }
  0x72   :  { %748 = vmatpush.msra.mxu0 %v579_v13  ;;  %v815_v13 = vlaneseq }
  0x73   :  { %783 = vmatpush.msra.mxu1 %v1249_v29 }
  0x74   :  { %752 = vmatpush.msra.mxu0 %v585_v25  ;;  %v816_v25 = vand.u32 127, %v815_v13 }
  0x75   :  { %785 = vmatpush.msra.mxu1 %v1256_v34  ;;  %v850_v34 = vld [vmem:[%s1362_s6] ss:$0 sm:$0xff]  ;;  %s827_s6 = sshll.u32 %s1014_s4, 4  ;;  %s828_s6 = int_to_ptr.vmem [resolvable:$true] %s827_s6 }
  0x76   :  { %756 = vmatpush.msra.mxu0 %v591_v32  ;;  %vm817_vm2 = vcmp.ge.s32.totalorder %v816_v25, 16 }
  0x77   :  { %787 = vmatpush.msra.mxu1 %v1270_v49 }
  0x79   :  { %789 = vmatpush.msra.mxu1 %v1279_v63 }
  0x7b   :  { %791 = vmatpush.msra.mxu1 %v1292_v6 }
  0x7d   :  { %793 = vmatpush.msra.mxu1 %v1300_v19 }
  0x9c   :  { %v354_v55 = vpop.f32.mrf.mxu0 }
  0x9d   :  { %v379_v61 = vpop.f32.mrf.mxu1 }
  0xa6   :  { %v135_v36 = vpop.f32.mrf.mxu2 }
  0xa7   :  { %v166_v37 = vpop.f32.mrf.mxu3 }
  0xa8   :  { %v167_v44 = vadd.f32 %v166_v37, %v135_v36 }
  0xae   :  { %v192_v38 = vpop.f32.mrf.mxu2 }
  0xaf   :  { %v217_v43 = vpop.f32.mrf.mxu3  ;;  %v193_v45 = vadd.f32 %v192_v38, %v167_v44 }
  0xb1   :  { %v218_v47 = vadd.f32 %v217_v43, %v193_v45 }
  0xb6   :  { %v244_v46 = vpop.f32.mrf.mxu2 }
  0xb7   :  { %v267_v48 = vpop.f32.mrf.mxu3  ;;  %v245_v50 = vadd.f32 %v244_v46, %v218_v47 }
  0xb9   :  { %v268_v51 = vadd.f32 %v267_v48, %v245_v50 }
  0xbe   :  { %v297_v52 = vpop.f32.mrf.mxu2 }
  0xbf   :  { %v298_v53 = vadd.f32 %v297_v52, %v268_v51  ;;  %v328_v54 = vpop.f32.mrf.mxu3 }
  0xc1   :  { %v329_v57 = vadd.f32 %v328_v54, %v298_v53 }
  0xc3   :  { %v355_v1 = vadd.f32 %v354_v55, %v329_v57 }
  0xc5   :  { %v380_v12 = vadd.f32 %v379_v61, %v355_v1 }
  0xc6   :  { %v406_v14 = vpop.f32.mrf.mxu2 }
  0xc7   :  { %v407_v15 = vadd.f32 %v406_v14, %v380_v12  ;;  %v429_v16 = vpop.f32.mrf.mxu3 }
  0xc9   :  { %v430_v18 = vadd.f32 %v429_v16, %v407_v15 }
  0xcb   :  { %v436_v21 = vadd.f32 %v849_v17, %v430_v18 }
  0xcd   :  { %v437_v22 = vmax.f32 %v436_v21, 0.0 }
  0xcf   :  { %v490_v23 = vand.u32 4294901760, %v437_v22 }
  0xd1   :  { %v491_v27 = vsub.f32 %v437_v22, %v490_v23  ;;  %596 = vmatmul.f32.vlgmr.msrb.gmra.mxu1 %v490_v23 }
  0xd3   :  { %650 = vmatmul.f32.vlgmr.msrb.gmra.mxu2 %v491_v27  ;;  %v492_v28 = vand.u32 4294901760, %v491_v27 }
  0xd5   :  { %689 = vmatmul.f32.vlgmr.msrb.gmra.mxu3 %v492_v28  ;;  %v493_v29 = vsub.f32 %v491_v27, %v492_v28 }
  0xd7   :  { %v494_v33 = vand.u32 4294901760, %v493_v29 }
  0xd9   :  { %495 = vmatmul.f32.vlgmr.msrb.gmra.mxu0 %v494_v33  ;;  %795 = vmatmul.f32.vlgmr.msra.gmra.mxu1 %v490_v23 }
  0xe1   :  { %758 = vmatmul.f32.vlgmr.msra.gmra.mxu0 %v490_v23 }
 0x14e   :  { %v597_v35 = vpop.f32.mrf.mxu1 }
 0x156   :  { %v496_v42 = vpop.f32.mrf.mxu0  ;;  %v651_v58 = vpop.f32.mrf.mxu2 }
 0x157   :  { %v497_v49 = vadd.f32 %v850_v34, %v496_v42  ;;  %v796_v2 = vpop.f32.mrf.mxu1 }
 0x158   :  { %v690_v60 = vpop.f32.mrf.mxu3 }
 0x159   :  { %v598_v56 = vadd.f32 %v597_v35, %v497_v49 }
 0x15b   :  { %v652_v59 = vadd.f32 %v651_v58, %v598_v56 }
 0x15d   :  { %v691_v62 = vadd.f32 %v690_v60, %v652_v59 }
 0x15e   :  { %v759_v63 = vpop.f32.mrf.mxu0 }
 0x15f   :  { %v760_v0 = vadd.f32 %v759_v63, %v691_v62 }
 0x161   :  { %v797_v3 = vadd.f32 %v796_v2, %v760_v0 }
 0x163   :  { %v800_v4 = vand.u32 2147483647, %v797_v3  ;;  %v799_v26 = vmax.f32 %v797_v3, 0.0 }
 0x165   :  { %v801_v5 = vsub.f32 0.0, %v800_v4 }
 0x167   :  { %v802_v6 = vmul.f32 1.442695, %v801_v5 }
 0x169   :  { %851 = vpow2.f32 %v802_v6 }
 0x16f   :  { %v852_v7 = vpop.eup %851 }
 0x170   :  { %v804_v8 = vadd.f32 1.0, %v852_v7  ;;  %v807_v9 = vmul.f32 -0.5, %v852_v7  ;;  %v810_v10 = vand.u32 2147483647, %v852_v7 }
 0x172   :  { %853 = vlog2.f32 %v804_v8  ;;  %v808_v11 = vadd.f32 1.0, %v807_v9  ;;  %vm811_vm1 = vcmp.lt.f32.partialorder %v810_v10, 0.0004427343 }
 0x174   :  { %v809_v24 = vmul.f32 %v852_v7, %v808_v11 }
 0x178   :  { %v854_v19 = vpop.eup %853 }
 0x179   :  { %v806_v20 = vmul.f32 0.6931472, %v854_v19 }
 0x17b   :  { %v812_v30 = vsel %vm811_vm1, %v809_v24, %v806_v20 }
 0x17c   :  { %v813_v31 = vadd.f32 %v812_v30, %v799_v26 }
 0x17e   :  { %v814_v32 = vadd.f32 0.1, %v813_v31 }
 0x180   :  { %v820_v39 = vsel %vm817_vm2, %v814_v32, %v797_v3 }
 0x181   :  { %821 = vst [vmem:[#allocation11] sm:$0xff] %v820_v39 }
 0x182   :  { %832 = dma.vmem_to_hbm [thread:$0]  %s828_s6, 128, %s830_s29, [#allocation4]  }
 0x183   :  { %1005 = dma.done.wait [#allocation4], 128  }
 0x184   :  { %1006 = vsyncadd [#allocation4], 4294967168 }
 0x185   :  { %837 = vsyncpa [#allocation3], 1 }
 0x186   :  { %838 = vsyncpa [#allocation6], 1 }
 0x187   :  { %839 = vsyncpa [#allocation9], 1 }
 0x188   :  { %840 = vsyncpa [#allocation4], 1 }

</bundles_post_ra>
